<compile_context>
chip_gen: v6e
topology: v6e:2x2x1
jax: 0.10.0
libtpu: 0.0.40
codegen_flags: <defaults>
</compile_context>

<pallas_src>
import functools

import jax
import jax.numpy as jnp
from jax.experimental import pallas as pl
from jax.experimental.pallas import tpu as pltpu


def _round_up(x, m):
    return ((x + m - 1) // m) * m


def _attention_kernel(enc_ref, hid_ref, ctx_ref, w_ref, *, batch, tb):
    # enc_ref: (TB, T, H), hid_ref: (TB, H); outputs ctx (TB, H), weights (TB, T)
    enc = enc_ref[...]                                   # native dtype, loaded once
    hid = hid_ref[...]                                   # (TB, H)

    # scores[b, t] = sum_h enc[b, t, h] * hid[b, h]
    # VPU broadcast-multiply + lane (XLU) reduce over H; f32 accumulation.
    scores = jnp.sum((enc * hid[:, None, :]).astype(jnp.float32), axis=-1)  # (TB, T)

    # Mask padded batch rows of a ragged last block so they don't produce
    # inf/NaN lanes (results for those rows are discarded by the blocked write).
    if batch % tb != 0:
        row = pl.program_id(0) * tb + jax.lax.broadcasted_iota(
            jnp.int32, scores.shape, 0
        )
        scores = jnp.where(row < batch, scores, 0.0)

    # Numerically stable softmax over T (dim=1 of the original (B, T)); exact
    # divide so the user-visible weights match the reference softmax closely.
    m = jnp.max(scores, axis=-1, keepdims=True)          # (TB, 1)
    e = jnp.exp(scores - m)                              # (TB, T)
    denom = jnp.sum(e, axis=-1, keepdims=True)           # (TB, 1)
    attn = e / denom                                     # (TB, T), f32

    # context[b, h] = sum_t attn[b, t] * enc[b, t, h]
    # VPU multiply + sublane (XLU) reduce over T; f32 accumulation.
    ctx = jnp.sum(attn[:, :, None] * enc.astype(jnp.float32), axis=1)       # (TB, H)

    ctx_ref[...] = ctx.astype(ctx_ref.dtype)
    w_ref[...] = attn.astype(w_ref.dtype)


def _vmem_capacity_bytes():
    try:
        return int(pltpu.get_tpu_info().vmem_capacity_bytes)
    except Exception:
        return 64 * 1024 * 1024  # conservative: v7x per-TC capacity


def _batch_tile(B, T, H, dtype, vmem_cap):
    """Pick a batch tile for the (TB, T, H) encoder block.

    Budget the *layout-padded* enc block at ~vmem_cap/6 (double-buffered enc +
    hid + outputs + temps then stay well inside capacity on v5e/v6e/v7x), and
    cap TB so the grid keeps >= 2 (ideally >= 4) blocks when B allows it, so
    v7x megacore can shard the batch axis and the DMA pipeline has overlap.
    """
    itemsize = jnp.dtype(dtype).itemsize
    # Sublane multiple for the 2-D (TB, H)/(TB, T) blocks (TB sits on sublanes).
    sub = {4: 8, 2: 16, 1: 32}.get(itemsize, 8)

    # Layout-padded per-batch-row footprint of the enc block (lane dim -> 128,
    # sublane dim -> sub), not raw T*H.
    per_row = _round_up(T, sub) * _round_up(H, 128) * itemsize

    block_budget = max(4 * 1024 * 1024, vmem_cap // 6)
    rows_budget = max(sub, ((block_budget // per_row) // sub) * sub)

    # Keep >= 4 (or >= 2) grid steps when B is large enough to split on
    # sublane-aligned boundaries; otherwise the whole batch is one block.
    if B >= 4 * sub:
        rows_parallel = _round_up(pl.cdiv(B, 4), sub)
    elif B >= 2 * sub:
        rows_parallel = _round_up(pl.cdiv(B, 2), sub)
    else:
        rows_parallel = B

    tb = min(B, rows_budget, rows_parallel)
    if tb < B:
        tb = max(sub, (tb // sub) * sub)
    return tb


def attention(encoder_outputs, decoder_hidden):
    """encoder_outputs: (B, T, H), decoder_hidden: (B, H) -> (context (B,H), weights (B,T))."""
    B, T, H = encoder_outputs.shape
    assert decoder_hidden.shape == (B, H)

    dtype = encoder_outputs.dtype
    itemsize = jnp.dtype(dtype).itemsize
    vmem_cap = _vmem_capacity_bytes()
    TB = _batch_tile(B, T, H, dtype, vmem_cap)
    grid = (pl.cdiv(B, TB),)

    cost = pl.CostEstimate(
        flops=4 * B * T * H,                     # two B*T*H contractions
        transcendentals=B * T,                   # exp in the softmax
        bytes_accessed=(B * T * H + 3 * B * H + B * T) * itemsize,
    )

    kernel = functools.partial(_attention_kernel, batch=B, tb=TB)

    return pl.pallas_call(
        kernel,
        grid=grid,
        in_specs=[
            pl.BlockSpec((TB, T, H), lambda i: (i, 0, 0)),
            pl.BlockSpec((TB, H), lambda i: (i, 0)),
        ],
        out_specs=[
            pl.BlockSpec((TB, H), lambda i: (i, 0)),
            pl.BlockSpec((TB, T), lambda i: (i, 0)),
        ],
        out_shape=(
            jax.ShapeDtypeStruct((B, H), dtype),
            jax.ShapeDtypeStruct((B, T), dtype),
        ),
        compiler_params=pltpu.CompilerParams(
            # Batch blocks are independent -> megacore shards this axis (v7x: 2 TCs).
            dimension_semantics=("parallel",),
            # Raise the scoped-VMEM limit so the per-generation tile budget is
            # actually usable (default is only 16/32 MiB); leave ~25% headroom.
            vmem_limit_bytes=int(vmem_cap * 3 // 4),
        ),
        cost_estimate=cost,
    )(encoder_outputs, decoder_hidden)


def _attention_ref(encoder_outputs, decoder_hidden):
    scores = jnp.einsum("bth,bh->bt", encoder_outputs, decoder_hidden)
    attn = jax.nn.softmax(scores, axis=1)
    ctx = jnp.einsum("bt,bth->bh", attn, encoder_outputs)
    return ctx, attn


if __name__ == "__main__":
    # Attention has no learnable parameters (empty __init__), so no weights to init.
    B, T, H = 2, 8, 32
    key = jax.random.PRNGKey(0)
    k_enc, k_hid = jax.random.split(key)
    encoder_outputs = jax.random.normal(k_enc, (B, T, H), dtype=jnp.float32)
    decoder_hidden = jax.random.normal(k_hid, (B, H), dtype=jnp.float32)

    ctx, attn = attention(encoder_outputs, decoder_hidden)
    jax.block_until_ready((ctx, attn))

    ctx_ref, attn_ref = _attention_ref(encoder_outputs, decoder_hidden)
    assert jnp.allclose(ctx, ctx_ref, atol=1e-5, rtol=1e-4)
    assert jnp.allclose(attn, attn_ref, atol=1e-5, rtol=1e-4)

    print("KERNEL_OK")
</pallas_src>

<mosaic_0001>
module attributes {stable_mosaic.version = 11 : i64} {
  func.func @_attention_kernel(%arg0: i32, %arg1: memref<2x8x32xf32, #tpu.memory_space<vmem>>, %arg2: memref<2x32xf32, #tpu.memory_space<vmem>>, %arg3: memref<2x32xf32, #tpu.memory_space<vmem>>, %arg4: memref<2x8xf32, #tpu.memory_space<vmem>>) attributes {dimension_semantics = [#tpu.dimension_semantics<parallel>], iteration_bounds = array<i64: 1>, scalar_prefetch = 0 : i64, scratch_operands = 0 : i64, tpu.core_type = #tpu.core_type<tc>, window_params = [{transform_indices = @transform_0, window_bounds = array<i64: 2, 8, 32>}, {transform_indices = @transform_1, window_bounds = array<i64: 2, 32>}, {transform_indices = @transform_2, window_bounds = array<i64: 2, 32>}, {transform_indices = @transform_3, window_bounds = array<i64: 2, 8>}]} {
    %c0 = arith.constant 0 : index
    %c0_0 = arith.constant 0 : index
    %c0_1 = arith.constant 0 : index
    %0 = vector.load %arg1[%c0, %c0_0, %c0_1] : memref<2x8x32xf32, #tpu.memory_space<vmem>>, vector<2x8x32xf32>
    %c0_2 = arith.constant 0 : index
    %c0_3 = arith.constant 0 : index
    %1 = vector.load %arg2[%c0_2, %c0_3] : memref<2x32xf32, #tpu.memory_space<vmem>>, vector<2x32xf32>
    %2 = vector.shape_cast %1 : vector<2x32xf32> to vector<2x1x32xf32>
    %3 = vector.broadcast %2 : vector<2x1x32xf32> to vector<2x8x32xf32>
    %4 = arith.mulf %0, %3 : vector<2x8x32xf32>
    %cst = arith.constant dense<0.000000e+00> : vector<2x8xf32>
    %5 = vector.multi_reduction <add>, %4, %cst [2] : vector<2x8x32xf32> to vector<2x8xf32>
    %cst_4 = arith.constant dense<0xFF800000> : vector<2xf32>
    %6 = vector.multi_reduction <maximumf>, %5, %cst_4 [1] : vector<2x8xf32> to vector<2xf32>
    %7 = vector.shape_cast %6 : vector<2xf32> to vector<2x1xf32>
    %8 = vector.broadcast %7 : vector<2x1xf32> to vector<2x8xf32>
    %9 = arith.subf %5, %8 : vector<2x8xf32>
    %10 = math.exp %9 : vector<2x8xf32>
    %cst_5 = arith.constant dense<0.000000e+00> : vector<2xf32>
    %11 = vector.multi_reduction <add>, %10, %cst_5 [1] : vector<2x8xf32> to vector<2xf32>
    %12 = vector.shape_cast %11 : vector<2xf32> to vector<2x1xf32>
    %13 = vector.broadcast %12 : vector<2x1xf32> to vector<2x8xf32>
    %14 = arith.divf %10, %13 : vector<2x8xf32>
    %15 = vector.shape_cast %14 : vector<2x8xf32> to vector<2x8x1xf32>
    %16 = vector.broadcast %15 : vector<2x8x1xf32> to vector<2x8x32xf32>
    %17 = arith.mulf %16, %0 : vector<2x8x32xf32>
    %cst_6 = arith.constant dense<0.000000e+00> : vector<2x32xf32>
    %18 = vector.multi_reduction <add>, %17, %cst_6 [1] : vector<2x8x32xf32> to vector<2x32xf32>
    %c0_7 = arith.constant 0 : index
    %c0_8 = arith.constant 0 : index
    %19 = vector.load %arg3[%c0_7, %c0_8] : memref<2x32xf32, #tpu.memory_space<vmem>>, vector<2x32xf32>
    tpu.vector_store %arg3[%c0_7, %c0_8], %18 {strides = array<i32>} : memref<2x32xf32, #tpu.memory_space<vmem>>, vector<2x32xf32>,
    %c0_9 = arith.constant 0 : index
    %c0_10 = arith.constant 0 : index
    %20 = vector.load %arg4[%c0_9, %c0_10] : memref<2x8xf32, #tpu.memory_space<vmem>>, vector<2x8xf32>
    tpu.vector_store %arg4[%c0_9, %c0_10], %14 {strides = array<i32>} : memref<2x8xf32, #tpu.memory_space<vmem>>, vector<2x8xf32>,
    return
  }
  func.func @transform_0(%arg0: i32) -> (i32, i32, i32) {
    %c0_i32 = arith.constant 0 : i32
    %c0_i32_0 = arith.constant 0 : i32
    %c0_i32_1 = arith.constant 0 : i32
    return %arg0, %c0_i32, %c0_i32_0 : i32, i32, i32
  }
  func.func @transform_1(%arg0: i32) -> (i32, i32) {
    %c0_i32 = arith.constant 0 : i32
    %c0_i32_0 = arith.constant 0 : i32
    return %arg0, %c0_i32 : i32, i32
  }
  func.func @transform_2(%arg0: i32) -> (i32, i32) {
    %c0_i32 = arith.constant 0 : i32
    %c0_i32_0 = arith.constant 0 : i32
    return %arg0, %c0_i32 : i32, i32
  }
  func.func @transform_3(%arg0: i32) -> (i32, i32) {
    %c0_i32 = arith.constant 0 : i32
    %c0_i32_0 = arith.constant 0 : i32
    return %arg0, %c0_i32 : i32, i32
  }
}

</mosaic_0001>

<bundles_post_ra>
// kernel: tpu_custom_call.1
= control target key start
LH: loop header
LB: loop body
LE: loop exit
PB: predicated region body
PF: predicated region fallthrough
CT: control target
= control target key end

     0   :  { %9 = vsyncpa [#allocation3], 0  ;;  %s397_s0 = inlined_call_operand.hbm [shape: f32[2,8,32], index: 0, kind: input, shape index: {}]   ;;  %s398_s1 = inlined_call_operand.hbm [shape: f32[2,32], index: 1, kind: input, shape index: {}]   ;;  %s399_s2 = inlined_call_operand.hbm [shape: f32[2,32], index: 2, kind: output, shape index: {0}]   ;;  %s400_s3 = inlined_call_operand.hbm [shape: f32[2,8], index: 3, kind: output, shape index: {1}]  }
   0x1   :  { %10 = vsyncpa [#allocation6], 0 }
   0x2   :  { %11 = vsyncpa [#allocation4], 0 }
   0x3   :  { %12 = vsyncpa [#allocation9], 0  ;;  %s338_s12 = smov [#allocation2]  }
   0x4   :  { %s18_s13 = sshll.u32 %s338_s12, 4  ;;  %s19_s13 = int_to_ptr.vmem [resolvable:$true] %s18_s13 }
   0x5   :  { %s258_s14 = scalar_lea.vmem %s19_s13, 256  ;;  %p263_p1 = scmp.lt.s32.totalorder %s19_s13, %s19_s13 }
   0x6   :  { %p259_p0 = scmp.ne.s32.totalorder %s19_s13, %s258_s14  ;;  %p264_p2 = scmp.lt.s32.totalorder %s258_s14, %s258_s14 }
   0x8   :  { %p265_p3 = por %p264_p2, %p263_p1 }
   0xa   :  { %p266_p4 = pnand %p265_p3, %p259_p0 }
   0xc   :  { %269 = shalt.err (!%p266_p4)
}
   0xd   :  { %s339_s15 = smov 128   ;;  %s340_s16 = smov 8  }
   0xe   :  { %24 = dma.hbm_to_vmem [thread:$0]  %s397_s0, 256, %s19_s13, [#allocation3], %s339_s15, %s339_s15, %s340_s16  }
   0xf   :  { %s341_s19 = smov [#allocation5]  }
  0x10   :  { %s31_s20 = sshll.u32 %s341_s19, 4  ;;  %s32_s20 = int_to_ptr.vmem [resolvable:$true] %s31_s20 }
  0x11   :  { %s278_s21 = scalar_lea.vmem %s32_s20, 32  ;;  %p283_p6 = scmp.lt.s32.totalorder %s32_s20, %s32_s20 }
  0x12   :  { %p279_p5 = scmp.ne.s32.totalorder %s32_s20, %s278_s21  ;;  %p284_p7 = scmp.lt.s32.totalorder %s278_s21, %s278_s21 }
  0x14   :  { %p285_p8 = por %p284_p7, %p283_p6 }
  0x16   :  { %p286_p9 = pnand %p285_p8, %p279_p5 }
  0x18   :  { %289 = shalt.err (!%p286_p9)
}
  0x19   :  { %34 = dma.hbm_to_vmem [thread:$0]  %s398_s1, 32, %s32_s20, [#allocation6]  }
  0x1a   :  { %330 = dma.done.wait [#allocation3], 256  }
  0x1b   :  { %331 = vsyncadd [#allocation3], 4294967040 }
  0x1c   :  { %332 = dma.done.wait [#allocation6], 32  }
  0x1d   :  { %333 = vsyncadd [#allocation6], 4294967264  ;;  %v56_v0 = vlaneseq  ;;  %v342_v1 = vmov 1966171168   ;;  %v41_v12 = vld [vmem:[#allocation2] sm:$0xff]  ;;  %vm79_vm0 = vcmask 261120  }
  0x1e   :  { %v54_v2 = vunpack.c.l.s4 %v342_v1  ;;  %v231_v9 = vld.sshfl [vmem:[#allocation5] sm:$0x11 pattern:$0x75316420]  ;;  %v42_v15 = vld [vmem:[#allocation2 + $0x8] sm:$0xff]  ;;  %vm98_vm1 = vcmask 1041409  }
  0x1f   :  { %v57_v3 = vshrl.u32 %v56_v0, 7  ;;  %v89_v4 = vand.u32 127, %v56_v0  ;;  %v52_v10 = vcombine.high %v231_v9, %v231_v9  ;;  %vm101_vm2 = vcmask 58368   ;;  %s344_s0 = smov [#allocation8]  }
  0x20   :  { %v55_v5 = vunpack.c.0.s8 %v54_v2  ;;  %v343_v27 = vmov 0   ;;  %s217_s1 = sshll.u32 %s344_s0, 4  ;;  %s218_s1 = int_to_ptr.vmem [resolvable:$true] %s217_s1 }
  0x21   :  { %v372_v6 = vsub.s32 %v89_v4, %v57_v3  ;;  %v69_v8 = vsub.s32 0, %v57_v3  ;;  %241 = vset.pattern.permute.xlu0 %v343_v27  ;;  %240 = vset.pattern.permute.xlu1 %v343_v27  ;;  %v112_v28 = vsub.s32 1, %v57_v3  ;;  %s290_s24 = scalar_lea.vmem %s218_s1, 32  ;;  %p295_p11 = scmp.lt.s32.totalorder %s218_s1, %s218_s1 }
  0x22   :  { %v58_v7 = vsub.s32 %v55_v5, %v57_v3  ;;  %p291_p10 = scmp.ne.s32.totalorder %s218_s1, %s290_s24  ;;  %p296_p12 = scmp.lt.s32.totalorder %s290_s24, %s290_s24 }
  0x24   :  { %v59_v11 = vrot.slane %v231_v9, %v58_v7  ;;  %v66_v14 = vrot.slane %v52_v10, %v58_v7  ;;  %p297_p13 = por %p296_p12, %p295_p11 }
  0x26   :  { %v70_v13 = vrot.slane %v59_v11, %v69_v8  ;;  %v74_v17 = vrot.slane %v66_v14, %v69_v8  ;;  %p298_p0 = pnand %p297_p13, %p291_p10 }
  0x28   :  { %v77_v16 = vmul.f32 %v70_v13, %v41_v12  ;;  %v78_v19 = vmul.f32 %v74_v17, %v42_v15 }
  0x2a   :  { %v80_v18 = vsel %vm79_vm0, %v77_v16, 0.0  ;;  %v83_v20 = vsel %vm79_vm0, %v78_v19, 0.0 }
  0x2b   :  { %81 = vadd.xlane.f32.xlu0 %v80_v18 }
  0x2f   :  { %84 = vadd.xlane.f32.xlu0 %v83_v20 }
  0xb4   :  { %v82_v21 = vpop.xlane.xlu0 %81 }
  0xb5   :  { %v93_v23 = vrot.slane %v82_v21, %v372_v6 }
  0xb8   :  { %v85_v22 = vpop.xlane.xlu0 %84 }
  0xb9   :  { %v97_v24 = vrot.slane %v85_v22, %v372_v6 }
  0xbb   :  { %v99_v25 = vsel %vm98_vm1, %v97_v24, %v93_v23 }
  0xbc   :  { %v102_v26 = vsel %vm101_vm2, %v99_v25, -inf }
  0xbd   :  { %103 = vmax.xlane.f32.xlu1 %v102_v26 }
 0x146   :  { %v104_v29 = vpop.xlane.xlu1 %103 }
 0x147   :  { %v109_v30 = vrot.slane %v104_v29, %v69_v8  ;;  %v113_v31 = vrot.slane %v104_v29, %v112_v28 }
 0x149   :  { %v116_v32 = vsub.f32 %v82_v21, %v109_v30  ;;  %v117_v33 = vsub.f32 %v85_v22, %v113_v31 }
 0x14b   :  { %v118_v34 = vmul.f32 1.442695, %v116_v32  ;;  %v120_v35 = vmul.f32 1.442695, %v117_v33 }
 0x14d   :  { %242 = vpow2.f32 %v118_v34 }
 0x14e   :  { %244 = vpow2.f32 %v120_v35 }
 0x15a   :  { %v243_v36 = vpop.eup %242 }
 0x15b   :  { %v245_v37 = vpop.eup %244  ;;  %125 = vperm.xlu1 %240, %v243_v36  }
 0x15c   :  { %128 = vperm.xlu0 %241, %v245_v37  }
 0x1d6   :  { %v126_v38 = vpop.permute.xlu1 %125 }
 0x1d7   :  { %v129_v39 = vpop.permute.xlu0 %128  ;;  %v133_v40 = vrot.slane %v126_v38, %v372_v6 }
 0x1d8   :  { %v137_v41 = vrot.slane %v129_v39, %v372_v6 }
 0x1da   :  { %v138_v42 = vsel %vm98_vm1, %v137_v41, %v133_v40 }
 0x1db   :  { %v140_v43 = vsel %vm101_vm2, %v138_v42, 0.0 }
 0x1dc   :  { %141 = vadd.xlane.f32.xlu1 %v140_v43 }
 0x265   :  { %v142_v44 = vpop.xlane.xlu1 %141 }
 0x266   :  { %v147_v45 = vrot.slane %v142_v44, %v69_v8  ;;  %v151_v46 = vrot.slane %v142_v44, %v112_v28 }
 0x268   :  { %246 = vrcp.f32 %v147_v45 }
 0x269   :  { %248 = vrcp.f32 %v151_v46 }
 0x275   :  { %v247_v47 = vpop.eup %246 }
 0x276   :  { %v155_v48 = vmul.f32 %v247_v47, %v243_v36  ;;  %v249_v49 = vpop.eup %248 }
 0x277   :  { %v157_v50 = vmul.f32 %v249_v49, %v245_v37 }
 0x278   :  { %160 = vperm.xlu0 %241, %v155_v48  }
 0x27c   :  { %165 = vperm.xlu0 %241, %v157_v50  }
 0x2f3   :  { %v161_v51 = vpop.permute.xlu0 %160 }
 0x2f4   :  { %v168_v52 = vmul.f32 %v161_v51, %v41_v12  ;;  %v193_v56 = vrot.slane %v161_v51, %v372_v6 }
 0x2f6   :  { %v170_v53 = vsel %vm79_vm0, %v168_v52, 0.0 }
 0x2f7   :  { %v171_v54 = vrot.slane %v170_v53, 4  ;;  %v166_v55 = vpop.permute.xlu0 %165 }
 0x2f8   :  { %v169_v57 = vmul.f32 %v166_v55, %v42_v15  ;;  %v197_v58 = vrot.slane %v166_v55, %v372_v6 }
 0x2f9   :  { %v172_v59 = vadd.f32 %v171_v54, %v170_v53 }
 0x2fa   :  { %v177_v60 = vsel %vm79_vm0, %v169_v57, 0.0  ;;  %v198_v61 = vsel %vm98_vm1, %v197_v58, %v193_v56 }
 0x2fb   :  { %v173_v62 = vrot.slane %v172_v59, 2  ;;  %v178_v63 = vrot.slane %v177_v60, 4  ;;  %200 = vst.msk [vmem:[#allocation8] sm:$0x3] %vm101_vm2, %v198_v61 }
 0x2fc   :  { %301 = shalt.err (!%p298_p0)
}
 0x2fd   :  { %220 = dma.vmem_to_hbm [thread:$0]  %s218_s1, 32, %s400_s3, [#allocation9]   ;;  %v174_v0 = vadd.f32 %v173_v62, %v172_v59  ;;  %v179_v1 = vadd.f32 %v178_v63, %v177_v60  ;;  %vm188_vm3 = vcmask 254976  }
 0x2fe   :  { %s345_s27 = smov [#allocation7]  }
 0x2ff   :  { %v180_v2 = vrot.slane %v179_v1, 2  ;;  %v175_v3 = vrot.slane %v174_v0, 1  ;;  %s207_s28 = sshll.u32 %s345_s27, 4  ;;  %s208_s28 = int_to_ptr.vmem [resolvable:$true] %s207_s28 }
 0x300   :  { %s310_s29 = scalar_lea.vmem %s208_s28, 32  ;;  %p315_p2 = scmp.lt.s32.totalorder %s208_s28, %s208_s28 }
 0x301   :  { %v181_v4 = vadd.f32 %v180_v2, %v179_v1  ;;  %v176_v7 = vadd.f32 %v175_v3, %v174_v0  ;;  %p311_p1 = scmp.ne.s32.totalorder %s208_s28, %s310_s29  ;;  %p316_p3 = scmp.lt.s32.totalorder %s310_s29, %s310_s29 }
 0x303   :  { %v182_v5 = vrot.slane %v181_v4, 1  ;;  %p317_p4 = por %p316_p3, %p315_p2 }
 0x305   :  { %v183_v6 = vadd.f32 %v182_v5, %v181_v4  ;;  %p318_p5 = pnand %p317_p4, %p311_p1 }
 0x307   :  { %v186_v8 = vsel %vm98_vm1, %v183_v6, %v176_v7 }
 0x308   :  { %189 = vst.msk [vmem:[#allocation7] sm:$0x3] %vm188_vm3, %v186_v8 }
 0x309   :  { %321 = shalt.err (!%p318_p5)
}
 0x30a   :  { %210 = dma.vmem_to_hbm [thread:$0]  %s208_s28, 32, %s399_s2, [#allocation4]  }
 0x30b   :  { %334 = dma.done.wait [#allocation4], 32  }
 0x30c   :  { %335 = vsyncadd [#allocation4], 4294967264 }
 0x30d   :  { %336 = dma.done.wait [#allocation9], 32  }
 0x30e   :  { %337 = vsyncadd [#allocation9], 4294967264 }
 0x30f   :  { %227 = vsyncpa [#allocation3], 1 }
 0x310   :  { %228 = vsyncpa [#allocation6], 1 }
 0x311   :  { %229 = vsyncpa [#allocation4], 1 }
 0x312   :  { %230 = vsyncpa [#allocation9], 1 }

</bundles_post_ra>
